<compile_context>
chip_gen: v5e
topology: v5e:2x2
jax: 0.10.0
libtpu: 0.0.40
codegen_flags: <defaults>
</compile_context>

<pallas_src>
import math

import jax
import jax.numpy as jnp
from jax import lax
from jax.experimental import pallas as pl
from jax.experimental.pallas import tpu as pltpu


def _round_up(x, m):
    return ((x + m - 1) // m) * m


# ----------------------------------------------------------------------------
# Kernel 1: row-tiled dense  X @ W + b   (GraphConv weight/bias application)
# ----------------------------------------------------------------------------
def _linear_kernel(x_ref, w_ref, b_ref, o_ref):
    acc = jnp.dot(x_ref[...], w_ref[...], preferred_element_type=jnp.float32)
    o_ref[...] = (acc + b_ref[...]).astype(o_ref.dtype)


def pallas_linear(x, w, b, *, tile_m=256):
    """x: [M, K], w: [K, C], b: [C]  ->  [M, C] = x @ w + b (f32 accumulate on the MXU)."""
    M, K = x.shape
    Kw, C = w.shape
    assert Kw == K
    # Lane-dense padding of contraction / output feature dims (perf feedback).
    Kp = _round_up(K, 128)
    Cp = _round_up(C, 128)
    tile = max(8, min(tile_m, _round_up(M, 8)))
    Mp = _round_up(M, tile)

    xp = jnp.pad(x.astype(jnp.float32), ((0, Mp - M), (0, Kp - K)))
    wp = jnp.pad(w.astype(jnp.float32), ((0, Kp - K), (0, Cp - C)))
    bp = jnp.pad(b.astype(jnp.float32), (0, Cp - C)).reshape(1, Cp)

    out = pl.pallas_call(
        _linear_kernel,
        out_shape=jax.ShapeDtypeStruct((Mp, Cp), jnp.float32),
        grid_spec=pltpu.PrefetchScalarGridSpec(
            num_scalar_prefetch=0,
            grid=(Mp // tile,),
            in_specs=[
                pl.BlockSpec((tile, Kp), lambda i: (i, 0)),   # row tile of X
                pl.BlockSpec((Kp, Cp), lambda i: (0, 0)),     # whole W (resident)
                pl.BlockSpec((1, Cp), lambda i: (0, 0)),      # bias (resident)
            ],
            out_specs=pl.BlockSpec((tile, Cp), lambda i: (i, 0)),
        ),
        compiler_params=pltpu.CompilerParams(
            dimension_semantics=("parallel",),
            vmem_limit_bytes=32 * 1024 * 1024,   # safe on v7x's 64 MiB VMEM as well
        ),
        cost_estimate=pl.CostEstimate(
            flops=2 * Mp * Kp * Cp,
            transcendentals=0,
            bytes_accessed=4 * (Mp * Kp + Kp * Cp + Cp + Mp * Cp),
        ),
    )(xp, wp, bp)
    return out[:M, :C]


# ----------------------------------------------------------------------------
# Kernel 2: fused-gather u_dot_v edge predictor
#   score[e, 0] = sum_f h_src[src[e], f] * h_dst[dst[e], f]
# Node tables resident in VMEM; edge ids scalar-prefetched to SMEM; 512-edge tiles.
# ----------------------------------------------------------------------------
def _edge_dot_kernel(src_ids_ref, dst_ids_ref, hs_tab_ref, hd_tab_ref, o_ref,
                     hs_buf, hd_buf):
    te = hs_buf.shape[0]
    base = pl.program_id(0) * te

    def gather_row(e, carry):
        s = src_ids_ref[base + e]                      # scalar read from SMEM
        d = dst_ids_ref[base + e]
        hs_buf[pl.ds(e, 1), :] = hs_tab_ref[pl.ds(s, 1), :]   # in-kernel row gather
        hd_buf[pl.ds(e, 1), :] = hd_tab_ref[pl.ds(d, 1), :]
        return carry

    lax.fori_loop(0, te, gather_row, 0)

    prod = hs_buf[...] * hd_buf[...]
    o_ref[...] = jnp.sum(prod, axis=1, keepdims=True).astype(o_ref.dtype)


def pallas_edge_dot(h_src_tab, h_dst_tab, src_ids, dst_ids, *, edge_tile=512):
    """h_src_tab: [Ns, F], h_dst_tab: [Nd, F], src_ids/dst_ids: [E] int32 -> [E, 1]."""
    Ns, F = h_src_tab.shape
    Nd, Fd = h_dst_tab.shape
    assert Fd == F
    E = src_ids.shape[0]

    Fp = _round_up(F, 128)                    # lane-dense feature dim (perf feedback)
    Nsp = _round_up(Ns, 8)
    Ndp = _round_up(Nd, 8)
    te = min(_round_up(edge_tile, 128), _round_up(E, 128))   # big tiles, no E%tile assert
    Ep = _round_up(E, te)

    hs = jnp.pad(h_src_tab.astype(jnp.float32), ((0, Nsp - Ns), (0, Fp - F)))
    hd = jnp.pad(h_dst_tab.astype(jnp.float32), ((0, Ndp - Nd), (0, Fp - F)))
    srcp = jnp.pad(src_ids.astype(jnp.int32), (0, Ep - E))    # pad ids with 0 (valid row)
    dstp = jnp.pad(dst_ids.astype(jnp.int32), (0, Ep - E))

    # TODO(synk): for node tables too large for VMEM, switch the tables to
    # memory_space=pl.ANY and do a manual double-buffered make_async_copy row gather.
    scores = pl.pallas_call(
        _edge_dot_kernel,
        out_shape=jax.ShapeDtypeStruct((Ep, 1), jnp.float32),
        grid_spec=pltpu.PrefetchScalarGridSpec(
            num_scalar_prefetch=2,            # src_ids, dst_ids live in SMEM
            grid=(Ep // te,),
            in_specs=[
                pl.BlockSpec((Nsp, Fp), lambda i, s, d: (0, 0)),   # h_src table (resident)
                pl.BlockSpec((Ndp, Fp), lambda i, s, d: (0, 0)),   # h_dst table (resident)
            ],
            out_specs=pl.BlockSpec((te, 1), lambda i, s, d: (i, 0)),
            scratch_shapes=[
                pltpu.VMEM((te, Fp), jnp.float32),
                pltpu.VMEM((te, Fp), jnp.float32),
            ],
        ),
        compiler_params=pltpu.CompilerParams(
            dimension_semantics=("parallel",),
            vmem_limit_bytes=32 * 1024 * 1024,
        ),
        cost_estimate=pl.CostEstimate(
            flops=2 * Ep * Fp,
            transcendentals=0,
            bytes_accessed=4 * ((Nsp + Ndp) * Fp + 3 * Ep),
        ),
    )(srcp, dstp, hs, hd)
    return scores[:E]


# ----------------------------------------------------------------------------
# Graph glue (plain JAX): DGL GraphConv / HeteroGraphConv('sum') semantics
# ----------------------------------------------------------------------------
def graph_conv(h_src, src_ids, dst_ids, n_dst, w, b, linear_fn):
    """DGL GraphConv(norm='both', bias=True) on one bipartite relation."""
    n_src = h_src.shape[0]
    ones = jnp.ones(src_ids.shape, jnp.float32)
    out_deg = jax.ops.segment_sum(ones, src_ids, num_segments=n_src)
    in_deg = jax.ops.segment_sum(ones, dst_ids, num_segments=n_dst)
    norm_src = lax.rsqrt(jnp.maximum(out_deg, 1.0))
    norm_dst = lax.rsqrt(jnp.maximum(in_deg, 1.0))
    msg = (h_src * norm_src[:, None])[src_ids]                 # [E, F] gather (glue)
    # TODO(synk): the per-relation sparse scatter-add (DGL message aggregation) stays
    # in XLA; a sorted-edge Pallas segment-sum kernel could fuse this step too.
    agg = jax.ops.segment_sum(msg, dst_ids, num_segments=n_dst)
    agg = agg * norm_dst[:, None]
    return linear_fn(agg, w, b)                                # Pallas matmul + bias


def hetero_conv(rel_edges, num_nodes, feats, layer_params, linear_fn):
    """HeteroGraphConv({rel: GraphConv}, aggregate='sum')."""
    out = {}
    for (stype, etype, dtype), (src_ids, dst_ids) in rel_edges.items():
        w, b = layer_params[etype]
        r = graph_conv(feats[stype], src_ids, dst_ids, num_nodes[dtype], w, b, linear_fn)
        out[dtype] = r if dtype not in out else out[dtype] + r
    return out


def grgcn_forward(params, rel_edges, num_nodes, x, pred_etype, neg_edges,
                  *, linear_fn, edge_dot_fn):
    """GRGCNModel.forward(g, neg_g, x, etype) -> (pos_score [E,1], neg_score [En,1])."""
    h = hetero_conv(rel_edges, num_nodes, x, params["layer1"], linear_fn)
    h = {k: jax.nn.relu(v) for k, v in h.items()}
    h = hetero_conv(rel_edges, num_nodes, h, params["layer2"], linear_fn)
    stype, _, dtype = pred_etype
    pos_src, pos_dst = rel_edges[pred_etype]
    neg_src, neg_dst = neg_edges
    pos = edge_dot_fn(h[stype], h[dtype], pos_src, pos_dst)    # HeteroDotProductPredictor(g)
    neg = edge_dot_fn(h[stype], h[dtype], neg_src, neg_dst)    # HeteroDotProductPredictor(neg_g)
    return pos, neg


# Pure-JAX reference implementations of the two kernelized ops.
def jnp_linear(x, w, b):
    return jnp.dot(x, w, precision=lax.Precision.HIGHEST) + b


def jnp_edge_dot(h_src_tab, h_dst_tab, src_ids, dst_ids):
    return jnp.sum(h_src_tab[src_ids] * h_dst_tab[dst_ids], axis=1, keepdims=True)


if __name__ == "__main__":
    key = jax.random.PRNGKey(0)
    keys = jax.random.split(key, 16)

    in_feats, hid_feats, out_feats = 16, 32, 16
    num_nodes = {"user": 24, "item": 32}
    rel_names = [("user", "follows", "user"),
                 ("user", "clicks", "item"),
                 ("item", "clicked-by", "user")]
    pred_etype = ("user", "clicks", "item")

    x = {"user": jax.random.normal(keys[0], (num_nodes["user"], in_feats), jnp.float32),
         "item": jax.random.normal(keys[1], (num_nodes["item"], in_feats), jnp.float32)}

    def rand_edges(ks, kd, stype, dtype, n_edges):
        src = jax.random.randint(ks, (n_edges,), 0, num_nodes[stype], dtype=jnp.int32)
        dst = jax.random.randint(kd, (n_edges,), 0, num_nodes[dtype], dtype=jnp.int32)
        return src, dst

    rel_edges = {
        ("user", "follows", "user"):    rand_edges(keys[2], keys[3], "user", "user", 40),
        ("user", "clicks", "item"):     rand_edges(keys[4], keys[5], "user", "item", 60),
        ("item", "clicked-by", "user"): rand_edges(keys[6], keys[7], "item", "user", 60),
    }
    neg_edges = rand_edges(keys[8], keys[9], "user", "item", 120)   # corrupted 'clicks' edges

    def init_layer(k, fan_in, fan_out):
        ws = jax.random.split(k, 2 * len(rel_names))
        layer = {}
        for i, (_, etype, _) in enumerate(rel_names):
            w = jax.random.normal(ws[2 * i], (fan_in, fan_out), jnp.float32) / math.sqrt(fan_in)
            b = 0.1 * jax.random.normal(ws[2 * i + 1], (fan_out,), jnp.float32)
            layer[etype] = (w, b)
        return layer

    params = {"layer1": init_layer(keys[10], in_feats, hid_feats),
              "layer2": init_layer(keys[11], hid_feats, out_feats)}

    # Pallas-kernel forward
    pos, neg = grgcn_forward(params, rel_edges, num_nodes, x, pred_etype, neg_edges,
                             linear_fn=pallas_linear, edge_dot_fn=pallas_edge_dot)
    pos, neg = jax.block_until_ready((pos, neg))

    # Pure-JAX reference of the identical forward
    pos_ref, neg_ref = grgcn_forward(params, rel_edges, num_nodes, x, pred_etype, neg_edges,
                                     linear_fn=jnp_linear, edge_dot_fn=jnp_edge_dot)
    pos_ref, neg_ref = jax.block_until_ready((pos_ref, neg_ref))

    assert pos.shape == (60, 1) and neg.shape == (120, 1)
    assert jnp.allclose(pos, pos_ref, atol=1e-2, rtol=1e-2), float(jnp.max(jnp.abs(pos - pos_ref)))
    assert jnp.allclose(neg, neg_ref, atol=1e-2, rtol=1e-2), float(jnp.max(jnp.abs(neg - neg_ref)))

    print("KERNEL_OK")
</pallas_src>

<mosaic_0001>
module attributes {stable_mosaic.version = 11 : i64} {
  func.func @_linear_kernel(%arg0: i32, %arg1: memref<24x128xf32, #tpu.memory_space<vmem>>, %arg2: memref<128x128xf32, #tpu.memory_space<vmem>>, %arg3: memref<1x128xf32, #tpu.memory_space<vmem>>, %arg4: memref<24x128xf32, #tpu.memory_space<vmem>>) attributes {dimension_semantics = [#tpu.dimension_semantics<parallel>], iteration_bounds = array<i64: 1>, scalar_prefetch = 0 : i64, scratch_operands = 0 : i64, tpu.core_type = #tpu.core_type<tc>, window_params = [{transform_indices = @transform_0, window_bounds = array<i64: 24, 128>}, {pipeline_mode = #tpu.pipeline_mode<synchronous>, transform_indices = @transform_1, window_bounds = array<i64: 128, 128>}, {pipeline_mode = #tpu.pipeline_mode<synchronous>, transform_indices = @transform_2, window_bounds = array<i64: 1, 128>}, {transform_indices = @transform_3, window_bounds = array<i64: 24, 128>}]} {
    %c0 = arith.constant 0 : index
    %c0_0 = arith.constant 0 : index
    %0 = vector.load %arg1[%c0, %c0_0] : memref<24x128xf32, #tpu.memory_space<vmem>>, vector<24x128xf32>
    %c0_1 = arith.constant 0 : index
    %c0_2 = arith.constant 0 : index
    %1 = vector.load %arg2[%c0_1, %c0_2] : memref<128x128xf32, #tpu.memory_space<vmem>>, vector<128x128xf32>
    %cst = arith.constant dense<0.000000e+00> : vector<24x128xf32>
    %2 = tpu.matmul %0, %1, %cst {dimension_numbers = #tpu.dot_dimension_numbers<[1], [0], [0], [1], [0, 0, 1, 1], [], []>} : vector<24x128xf32>, vector<128x128xf32>, vector<24x128xf32> -> vector<24x128xf32>
    %c0_3 = arith.constant 0 : index
    %c0_4 = arith.constant 0 : index
    %3 = vector.load %arg3[%c0_3, %c0_4] : memref<1x128xf32, #tpu.memory_space<vmem>>, vector<1x128xf32>
    %4 = vector.broadcast %3 : vector<1x128xf32> to vector<24x128xf32>
    %5 = arith.addf %2, %4 : vector<24x128xf32>
    %c0_5 = arith.constant 0 : index
    %c0_6 = arith.constant 0 : index
    %6 = vector.load %arg4[%c0_5, %c0_6] : memref<24x128xf32, #tpu.memory_space<vmem>>, vector<24x128xf32>
    tpu.vector_store %arg4[%c0_5, %c0_6], %5 {strides = array<i32>} : memref<24x128xf32, #tpu.memory_space<vmem>>, vector<24x128xf32>,
    return
  }
  func.func @transform_0(%arg0: i32) -> (i32, i32) {
    %c0_i32 = arith.constant 0 : i32
    %c0_i32_0 = arith.constant 0 : i32
    return %arg0, %c0_i32 : i32, i32
  }
  func.func @transform_1(%arg0: i32) -> (i32, i32) {
    %c0_i32 = arith.constant 0 : i32
    %c0_i32_0 = arith.constant 0 : i32
    %c0_i32_1 = arith.constant 0 : i32
    return %c0_i32, %c0_i32_0 : i32, i32
  }
  func.func @transform_2(%arg0: i32) -> (i32, i32) {
    %c0_i32 = arith.constant 0 : i32
    %c0_i32_0 = arith.constant 0 : i32
    %c0_i32_1 = arith.constant 0 : i32
    return %c0_i32, %c0_i32_0 : i32, i32
  }
  func.func @transform_3(%arg0: i32) -> (i32, i32) {
    %c0_i32 = arith.constant 0 : i32
    %c0_i32_0 = arith.constant 0 : i32
    return %arg0, %c0_i32 : i32, i32
  }
}

</mosaic_0001>

<bundles_post_ra>
// kernel: tpu_custom_call.1
= control target key start
LH: loop header
LB: loop body
LE: loop exit
PB: predicated region body
PF: predicated region fallthrough
CT: control target
= control target key end

     0   :  { %8 = vsyncpa [#allocation3], 0  ;;  %s281_s0 = inlined_call_operand.hbm [shape: f32[24,128], index: 0, kind: input, shape index: {}]   ;;  %s282_s1 = inlined_call_operand.hbm [shape: f32[128,128], index: 1, kind: input, shape index: {}]   ;;  %s283_s2 = inlined_call_operand.vmem [shape: f32[1,128], index: 2, kind: input, shape index: {}]   ;;  %s284_s3 = inlined_call_operand.hbm [shape: f32[24,128], index: 3, kind: output, shape index: {}]  }
   0x1   :  { %9 = vsyncpa [#allocation6], 0 }
   0x2   :  { %10 = vsyncpa [#allocation4], 0  ;;  %s15_s14 = sshll.u32 %s281_s0, 4  ;;  %s235_s15 = smov [#allocation2]   ;;  %s16_s14 = int_to_ptr.hbm [resolvable:$true] %s15_s14 }
   0x3   :  { %s17_s16 = sshll.u32 %s235_s15, 4  ;;  %s28_s19 = sshll.u32 %s282_s1, 4  ;;  %s18_s16 = int_to_ptr.vmem [resolvable:$true] %s17_s16  ;;  %s29_s19 = int_to_ptr.hbm [resolvable:$true] %s28_s19 }
   0x4   :  { %s236_s20 = smov 128   ;;  %s237_s21 = smov 8  }
   0x5   :  { %23 = dma.hbm_to_vmem [thread:$0]  %s16_s14, 384, %s18_s16, [#allocation3], %s236_s20, %s236_s20, %s237_s21  }
   0x6   :  { %s238_s22 = smov [#allocation5]  }
   0x7   :  { %s30_s23 = sshll.u32 %s238_s22, 4  ;;  %s31_s23 = int_to_ptr.vmem [resolvable:$true] %s30_s23 }
   0x8   :  { %36 = dma.hbm_to_vmem [thread:$0]  %s29_s19, 2048, %s31_s23, [#allocation6], %s236_s20, %s236_s20, %s237_s21  }
   0x9   :  { %229 = dma.done.wait [#allocation3], 384  }
   0xa   :  { %230 = vsyncadd [#allocation3], 4294966912 }
   0xb   :  { %231 = dma.done.wait [#allocation6], 2048  }
   0xc   :  { %232 = vsyncadd [#allocation6], 4294965248  ;;  %v65_v0 = vld [vmem:[#allocation5 + $0x78] sm:$0xff]  ;;  %v64_v1 = vld [vmem:[#allocation5 + $0x70] sm:$0xff]  ;;  %s239_s24 = smov [#allocation7]   ;;  %s105_s28 = sshll.u32 %s284_s3, 4  ;;  %s106_s28 = int_to_ptr.hbm [resolvable:$true] %s105_s28 }
   0xd   :  { %120 = vmatpush.msra.mxu2 %v65_v0  ;;  %70 = vmatpush.msra.mxu0 %v65_v0  ;;  %v63_v2 = vld [vmem:[#allocation5 + $0x68] sm:$0xff]  ;;  %v62_v3 = vld [vmem:[#allocation5 + $0x60] sm:$0xff]  ;;  %v61_v4 = vld [vmem:[#allocation5 + $0x58] sm:$0xff]  ;;  %s103_s25 = sshll.u32 %s239_s24, 4  ;;  %s104_s25 = int_to_ptr.vmem [resolvable:$true] %s103_s25 }
   0xe   :  { %119 = vmatpush.msra.mxu1 %v65_v0  ;;  %v60_v5 = vld [vmem:[#allocation5 + $0x50] sm:$0xff]  ;;  %v59_v6 = vld [vmem:[#allocation5 + $0x48] sm:$0xff]  ;;  %v58_v7 = vld [vmem:[#allocation5 + $0x40] sm:$0xff] }
   0xf   :  { %122 = vmatpush.msra.mxu2 %v64_v1  ;;  %71 = vmatpush.msra.mxu0 %v64_v1  ;;  %v57_v8 = vld [vmem:[#allocation5 + $0x38] sm:$0xff]  ;;  %v56_v9 = vld [vmem:[#allocation5 + $0x30] sm:$0xff]  ;;  %v55_v10 = vld [vmem:[#allocation5 + $0x28] sm:$0xff] }
  0x10   :  { %121 = vmatpush.msra.mxu1 %v64_v1  ;;  %v54_v11 = vld [vmem:[#allocation5 + $0x20] sm:$0xff]  ;;  %v53_v12 = vld [vmem:[#allocation5 + $0x18] sm:$0xff]  ;;  %v52_v13 = vld [vmem:[#allocation5 + $0x10] sm:$0xff] }
  0x11   :  { %124 = vmatpush.msra.mxu2 %v63_v2  ;;  %72 = vmatpush.msra.mxu0 %v63_v2  ;;  %v51_v14 = vld [vmem:[#allocation5 + $0x8] sm:$0xff]  ;;  %v50_v15 = vld [vmem:[#allocation5] sm:$0xff]  ;;  %v49_v16 = vld [vmem:[#allocation2 + $0x10] sm:$0xff] }
  0x12   :  { %123 = vmatpush.msra.mxu1 %v63_v2  ;;  %v47_v17 = vld [vmem:[#allocation2] sm:$0xff]  ;;  %v48_v18 = vld [vmem:[#allocation2 + $0x8] sm:$0xff] }
  0x13   :  { %126 = vmatpush.msra.mxu2 %v62_v3  ;;  %73 = vmatpush.msra.mxu0 %v62_v3  ;;  %v156_v19 = vld [vmem:[%s283_s2] ss:$0 sm:$0xff] }
  0x14   :  { %125 = vmatpush.msra.mxu1 %v62_v3 }
  0x15   :  { %128 = vmatpush.msra.mxu2 %v61_v4  ;;  %74 = vmatpush.msra.mxu0 %v61_v4 }
  0x16   :  { %127 = vmatpush.msra.mxu1 %v61_v4 }
  0x17   :  { %130 = vmatpush.msra.mxu2 %v60_v5  ;;  %75 = vmatpush.msra.mxu0 %v60_v5 }
  0x18   :  { %129 = vmatpush.msra.mxu1 %v60_v5 }
  0x19   :  { %132 = vmatpush.msra.mxu2 %v59_v6  ;;  %76 = vmatpush.msra.mxu0 %v59_v6 }
  0x1a   :  { %131 = vmatpush.msra.mxu1 %v59_v6 }
  0x1b   :  { %134 = vmatpush.msra.mxu2 %v58_v7  ;;  %77 = vmatpush.msra.mxu0 %v58_v7 }
  0x1c   :  { %133 = vmatpush.msra.mxu1 %v58_v7 }
  0x1d   :  { %136 = vmatpush.msra.mxu2 %v57_v8  ;;  %78 = vmatpush.msra.mxu0 %v57_v8 }
  0x1e   :  { %135 = vmatpush.msra.mxu1 %v57_v8 }
  0x1f   :  { %138 = vmatpush.msra.mxu2 %v56_v9  ;;  %79 = vmatpush.msra.mxu0 %v56_v9 }
  0x20   :  { %137 = vmatpush.msra.mxu1 %v56_v9 }
  0x21   :  { %140 = vmatpush.msra.mxu2 %v55_v10  ;;  %80 = vmatpush.msra.mxu0 %v55_v10 }
  0x22   :  { %139 = vmatpush.msra.mxu1 %v55_v10 }
  0x23   :  { %142 = vmatpush.msra.mxu2 %v54_v11  ;;  %81 = vmatpush.msra.mxu0 %v54_v11 }
  0x24   :  { %141 = vmatpush.msra.mxu1 %v54_v11 }
  0x25   :  { %144 = vmatpush.msra.mxu2 %v53_v12  ;;  %82 = vmatpush.msra.mxu0 %v53_v12 }
  0x26   :  { %143 = vmatpush.msra.mxu1 %v53_v12 }
  0x27   :  { %146 = vmatpush.msra.mxu2 %v52_v13  ;;  %83 = vmatpush.msra.mxu0 %v52_v13 }
  0x28   :  { %145 = vmatpush.msra.mxu1 %v52_v13 }
  0x29   :  { %148 = vmatpush.msra.mxu2 %v51_v14  ;;  %84 = vmatpush.msra.mxu0 %v51_v14 }
  0x2a   :  { %147 = vmatpush.msra.mxu1 %v51_v14 }
  0x2b   :  { %150 = vmatpush.msra.mxu2 %v50_v15  ;;  %85 = vmatpush.msra.mxu0 %v50_v15 }
  0x2c   :  { %92 = vmatmul.f32.vlgmr.msra.gmra.mxu2 %v49_v16  ;;  %149 = vmatpush.msra.mxu1 %v50_v15 }
  0x2d   :  { %86 = vmatmul.f32.vlgmr.msra.gmra.mxu0 %v47_v17  ;;  %89 = vmatmul.f32.vlgmr.msra.gmra.mxu1 %v48_v18 }
  0xaa   :  { %v87_v20 = vpop.f32.mrf.mxu0  ;;  %v90_v21 = vpop.f32.mrf.mxu1 }
  0xab   :  { %v88_v22 = vadd.f32 %v156_v19, %v87_v20  ;;  %v91_v23 = vadd.f32 %v156_v19, %v90_v21 }
  0xad   :  { %96 = vst [vmem:[#allocation7] sm:$0xff] %v88_v22 }
  0xae   :  { %97 = vst [vmem:[#allocation7 + $0x8] sm:$0xff] %v91_v23 }
  0xaf   :  { %v93_v24 = vpop.f32.mrf.mxu2 }
  0xb0   :  { %v94_v25 = vadd.f32 %v156_v19, %v93_v24 }
  0xb2   :  { %98 = vst [vmem:[#allocation7 + $0x10] sm:$0xff] %v94_v25 }
  0xb3   :  { %111 = dma.vmem_to_hbm [thread:$0]  %s104_s25, 384, %s106_s28, [#allocation4], %s236_s20, %s236_s20, %s237_s21  }
  0xb4   :  { %233 = dma.done.wait [#allocation4], 384  }
  0xb5   :  { %234 = vsyncadd [#allocation4], 4294966912 }
  0xb6   :  { %116 = vsyncpa [#allocation3], 1 }
  0xb7   :  { %117 = vsyncpa [#allocation6], 1 }
  0xb8   :  { %118 = vsyncpa [#allocation4], 1 }

</bundles_post_ra>
